<compile_context>
chip_gen: v7x
topology: tpu7x:2x2x1
jax: 0.10.0
libtpu: 0.0.40
codegen_flags: <defaults>
</compile_context>

<pallas_src>
import functools

import jax
import jax.numpy as jnp
from jax import lax
from jax.experimental import pallas as pl
from jax.experimental.pallas import tpu as pltpu

DEFAULT_TOK_BLOCK = 512  # max tokens per grid step (multiple of 8)


def _round_up(x, m):
    return (x + m - 1) // m * m


def _cdiv(a, b):
    return -(-a // b)


def _embeddings_kernel(ids_ref,                 # scalar-prefetch: flat word ids (SMEM)
                       tt_ref,                  # (tok_blk, 1) float32 token-type ids
                       word_hbm,                # (V, H) word table, left in HBM (pl.ANY)
                       type_ref,                # (T, H) token-type table (VMEM, resident)
                       gamma_ref, beta_ref,     # (1, H) LayerNorm params (VMEM, resident)
                       out_ref,                 # (tok_blk, H) output tile
                       gather_buf,              # (2, tok_blk, H) scratch, table dtype
                       sem,                     # (2,) DMA semaphores, one per slot
                       *, eps):
    tok_blk, H = out_ref.shape
    T = type_ref.shape[0]
    n_inner = pl.num_programs(1)
    c = pl.program_id(0)                        # outer chunk (parallel across TCs)
    j = pl.program_id(1)                        # inner block within chunk (sequential)
    blk = c * n_inner + j                       # flat token-block index
    slot = j % 2

    # ---- manual row gather: one small DMA per token row, native table dtype ----
    def issue_gathers(block_idx, slot_idx):
        base = block_idx * tok_blk

        @pl.loop(0, tok_blk // 8)
        def _(g):
            t0 = pl.multiple_of(g * 8, 8)
            for u in range(8):                  # 8 issues per scalar-loop iteration
                t = t0 + u
                wid = ids_ref[base + t]         # scalar read from SMEM
                pltpu.make_async_copy(
                    word_hbm.at[pl.ds(wid, 1), :],
                    gather_buf.at[slot_idx, pl.ds(t, 1), :],
                    sem.at[slot_idx],
                ).start()

    def wait_gathers(slot_idx):
        @pl.loop(0, tok_blk)
        def _(t):
            pltpu.make_async_copy(              # matching-shape descriptor for the wait
                word_hbm.at[pl.ds(0, 1), :],
                gather_buf.at[slot_idx, pl.ds(t, 1), :],
                sem.at[slot_idx],
            ).wait()

    # Prime the double buffer at the first inner step of this chunk.
    @pl.when(j == 0)
    def _():
        issue_gathers(blk, slot)

    # Prefetch the next block's rows into the other slot BEFORE blocking on this one,
    # so those DMAs overlap this block's LayerNorm compute.
    @pl.when(j + 1 < n_inner)
    def _():
        issue_gathers(blk + 1, 1 - slot)

    wait_gathers(slot)

    # ---- vectorized phase: type-emb add + LayerNorm, ~2 full-tile passes ----
    x = gather_buf[slot].astype(jnp.float32)          # one vectorized upcast
    tt = tt_ref[...]                                  # (tok_blk, 1) float32
    type_rows = type_ref[...].astype(jnp.float32)     # (T, H), loaded once per step

    if T == 2:
        r0 = type_rows[0:1, :]
        r1 = type_rows[1:2, :]
        s = r0 + tt * (r1 - r0)                       # single FMA select
    else:
        iota = lax.broadcasted_iota(jnp.float32, (tok_blk, T), 1)
        onehot = (tt == iota).astype(jnp.float32)     # (tok_blk, T)
        s = jnp.dot(onehot, type_rows, preferred_element_type=jnp.float32)

    y = x + s
    inv_h = 1.0 / H
    mu = jnp.sum(y, axis=-1, keepdims=True) * inv_h
    ex2 = jnp.sum(y * y, axis=-1, keepdims=True) * inv_h
    var = jnp.maximum(ex2 - mu * mu, 0.0)             # f32, clamp cancellation
    rstd = lax.rsqrt(var + eps)
    g = gamma_ref[...].astype(jnp.float32)
    b = beta_ref[...].astype(jnp.float32)
    out_ref[...] = ((y - mu) * rstd * g + b).astype(out_ref.dtype)


def rope_bert_embeddings(input_ids, token_type_ids, word_table, type_table,
                         gamma, beta, eps=1e-12, tok_block=DEFAULT_TOK_BLOCK):
    B, S = input_ids.shape
    N = B * S
    V, H = word_table.shape
    T = type_table.shape[0]

    # ---- grid / block selection: even block count for v7x, minimal tail padding ----
    n_blocks = max(1, _cdiv(N, tok_block))
    n_outer = 1 if n_blocks == 1 else 2              # give both v7x TensorCores work
    n_blocks = _round_up(n_blocks, n_outer)
    tok_blk = _round_up(_cdiv(N, n_blocks), 8)       # shrink block instead of padding a block
    n_inner = n_blocks // n_outer
    n_pad = n_blocks * tok_blk

    # Clip ids so bad indices cannot trigger OOB DMAs; pad tail with pad token 0.
    ids_flat = jnp.clip(input_ids.reshape(N).astype(jnp.int32), 0, V - 1)
    tt_flat = jnp.clip(token_type_ids.reshape(N).astype(jnp.int32), 0, T - 1)
    if n_pad != N:
        ids_flat = jnp.pad(ids_flat, (0, n_pad - N))
        tt_flat = jnp.pad(tt_flat, (0, n_pad - N))
    tt_col = tt_flat.astype(jnp.float32).reshape(n_pad, 1)
    gamma2 = gamma.reshape(1, H)
    beta2 = beta.reshape(1, H)

    resident = dict(pipeline_mode=pl.Buffered(1))    # constant-index small tensors
    out_dtype = word_table.dtype

    # VMEM budget computed from actual buffers (+ headroom), capped for v7x (64 MiB/TC).
    tbl_itemsize = jnp.dtype(word_table.dtype).itemsize
    out_itemsize = jnp.dtype(out_dtype).itemsize
    vmem_bytes = (2 * tok_blk * H * tbl_itemsize          # gather double buffer
                  + 2 * tok_blk * H * out_itemsize        # output double buffer
                  + 2 * tok_blk * 128 * 4                 # tt blocks (lane-padded)
                  + (T + 2) * max(H, 128) * 4             # type table + gamma + beta
                  + 8 * 1024 * 1024)                      # Mosaic internal scratch headroom
    vmem_limit = int(min(max(vmem_bytes, 16 * 1024 * 1024), 48 * 1024 * 1024))

    out = pl.pallas_call(
        functools.partial(_embeddings_kernel, eps=eps),
        out_shape=jax.ShapeDtypeStruct((n_pad, H), out_dtype),
        grid_spec=pltpu.PrefetchScalarGridSpec(
            num_scalar_prefetch=1,
            grid=(n_outer, n_inner),
            in_specs=[
                pl.BlockSpec((tok_blk, 1), lambda c, j, ids: (c * n_inner + j, 0)),
                pl.BlockSpec(memory_space=pl.ANY),                      # word table stays in HBM
                pl.BlockSpec((T, H), lambda c, j, ids: (0, 0), **resident),
                pl.BlockSpec((1, H), lambda c, j, ids: (0, 0), **resident),
                pl.BlockSpec((1, H), lambda c, j, ids: (0, 0), **resident),
            ],
            out_specs=pl.BlockSpec((tok_blk, H), lambda c, j, ids: (c * n_inner + j, 0)),
            scratch_shapes=[
                pltpu.VMEM((2, tok_blk, H), word_table.dtype),          # gather double buffer
                pltpu.SemaphoreType.DMA((2,)),                          # one DMA sem per slot
            ],
        ),
        compiler_params=pltpu.CompilerParams(
            dimension_semantics=("parallel", "arbitrary"),
            vmem_limit_bytes=vmem_limit,
        ),
    )(ids_flat, tt_col, word_table, type_table, gamma2, beta2)
    return out[:N].reshape(B, S, H)


def _reference(input_ids, token_type_ids, word_table, type_table, gamma, beta, eps):
    x = word_table[input_ids] + type_table[token_type_ids]
    mu = x.mean(-1, keepdims=True)
    var = ((x - mu) ** 2).mean(-1, keepdims=True)
    return (x - mu) / jnp.sqrt(var + eps) * gamma + beta


if __name__ == "__main__":
    # Small config: vocab_size=64, type_vocab_size=2, hidden_size=128, pad_token_id=0.
    V, T, H = 64, 2, 128
    pad_token_id = 0
    eps = 1e-12

    key = jax.random.PRNGKey(0)
    k1, k2, k3, k4 = jax.random.split(key, 4)
    word_table = 0.02 * jax.random.normal(k1, (V, H), jnp.float32)
    word_table = word_table.at[pad_token_id].set(0.0)   # nn.Embedding zeroes padding_idx row
    type_table = 0.02 * jax.random.normal(k2, (T, H), jnp.float32)
    gamma = 1.0 + 0.1 * jax.random.normal(k3, (H,), jnp.float32)
    beta = 0.1 * jax.random.normal(k4, (H,), jnp.float32)
    # position_embeddings exists in __init__ but is unused in forward (RoPE), so omitted.

    ok = True
    cases = (
        ((2, 8), 512, 1),    # single block
        ((3, 5), 512, 2),    # single block with padded tail
        ((2, 40), 16, 3),    # multi-block: 2 parallel chunks x several inner steps (double buffer)
        ((3, 21), 16, 4),    # multi-block with tail token inside the last block
    )
    for (B, S), tb, seed in cases:
        ka, kb = jax.random.split(jax.random.PRNGKey(seed))
        input_ids = jax.random.randint(ka, (B, S), 0, V, jnp.int32)
        token_type_ids = jax.random.randint(kb, (B, S), 0, T, jnp.int32)

        out = rope_bert_embeddings(input_ids, token_type_ids, word_table,
                                   type_table, gamma, beta, eps=eps, tok_block=tb)
        out = jax.block_until_ready(out)

        ref = _reference(input_ids, token_type_ids, word_table, type_table,
                         gamma, beta, eps)
        ok &= out.shape == (B, S, H)
        ok &= bool(jnp.allclose(out, ref, atol=1e-5, rtol=1e-5))

    assert ok, "mismatch vs reference"
    print("KERNEL_OK")
</pallas_src>

<mosaic_0001>
module attributes {stable_mosaic.version = 11 : i64} {
  func.func @_embeddings_kernel(%arg0: i32, %arg1: i32, %arg2: memref<16xi32, #tpu.memory_space<smem>>, %arg3: memref<16x1xf32, #tpu.memory_space<vmem>>, %arg4: memref<64x128xf32, #tpu.memory_space<any>>, %arg5: memref<2x128xf32, #tpu.memory_space<vmem>>, %arg6: memref<1x128xf32, #tpu.memory_space<vmem>>, %arg7: memref<1x128xf32, #tpu.memory_space<vmem>>, %arg8: memref<16x128xf32, #tpu.memory_space<vmem>>, %arg9: memref<2x16x128xf32, #tpu.memory_space<vmem>>, %arg10: memref<2x!tpu.dma_semaphore, #tpu.memory_space<semaphore_mem>>) attributes {dimension_semantics = [#tpu.dimension_semantics<parallel>, #tpu.dimension_semantics<arbitrary>], iteration_bounds = array<i64: 1, 1>, scalar_prefetch = 1 : i64, scratch_operands = 2 : i64, tpu.core_type = #tpu.core_type<tc>, window_params = [{transform_indices = @transform_0, window_bounds = array<i64: 16, 1>}, {}, {pipeline_mode = #tpu.pipeline_mode<synchronous>, transform_indices = @transform_2, window_bounds = array<i64: 2, 128>}, {pipeline_mode = #tpu.pipeline_mode<synchronous>, transform_indices = @transform_3, window_bounds = array<i64: 1, 128>}, {pipeline_mode = #tpu.pipeline_mode<synchronous>, transform_indices = @transform_4, window_bounds = array<i64: 1, 128>}, {transform_indices = @transform_5, window_bounds = array<i64: 16, 128>}]} {
    %c1_i32 = arith.constant 1 : i32
    %0 = arith.muli %arg0, %c1_i32 : i32
    %1 = arith.addi %0, %arg1 : i32
    %c2_i32 = arith.constant 2 : i32
    %c0_i32 = arith.constant 0 : i32
    %2 = arith.cmpi eq, %c2_i32, %c0_i32 : i32
    %c1_i32_0 = arith.constant 1 : i32
    %3 = arith.select %2, %c1_i32_0, %c2_i32 : i32
    %4 = arith.remsi %arg1, %3 : i32
    %c0_i32_1 = arith.constant 0 : i32
    %5 = arith.cmpi ne, %4, %c0_i32_1 : i32
    %c0_i32_2 = arith.constant 0 : i32
    %6 = arith.cmpi slt, %4, %c0_i32_2 : i32
    %c0_i32_3 = arith.constant 0 : i32
    %7 = arith.cmpi slt, %3, %c0_i32_3 : i32
    %8 = arith.xori %6, %7 : i1
    %9 = arith.andi %8, %5 : i1
    %10 = arith.addi %4, %3 : i32
    %11 = arith.select %9, %10, %4 : i32
    %c0_i32_4 = arith.constant 0 : i32
    %12 = arith.cmpi eq, %arg1, %c0_i32_4 : i32
    %13 = arith.extui %12 : i1 to i32
    %c0_i32_5 = arith.constant 0 : i32
    %14 = arith.cmpi ne, %13, %c0_i32_5 : i32
    scf.if %14 {
      %c16_i32_28 = arith.constant 16 : i32
      %61 = arith.muli %1, %c16_i32_28 : i32
      %c0_i32_29 = arith.constant 0 : i32
      %c2_i32_30 = arith.constant 2 : i32
      %62 = arith.addi %c0_i32_29, %c2_i32_30 : i32
      %c1_i32_31 = arith.constant 1 : i32
      scf.for %arg11 = %c0_i32_29 to %62 step %c1_i32_31  : i32 {
        %c1_i32_33 = arith.constant 1 : i32
        %63 = arith.muli %arg11, %c1_i32_33 : i32
        %c0_i32_34 = arith.constant 0 : i32
        %64 = arith.addi %c0_i32_34, %63 : i32
        %c8_i32 = arith.constant 8 : i32
        %65 = arith.muli %64, %c8_i32 : i32
        %66 = tpu.assume_multiple %65, 8 : i32
        %c0_i32_35 = arith.constant 0 : i32
        %67 = arith.addi %66, %c0_i32_35 : i32
        %68 = arith.addi %61, %67 : i32
        %69 = arith.index_cast %68 : i32 to index
        %70 = memref.load %arg2[%69] : memref<16xi32, #tpu.memory_space<smem>>
        %c0_i32_36 = arith.constant 0 : i32
        %71 = tpu.memref_slice %arg4[%70, %c0_i32_36] : memref<64x128xf32, #tpu.memory_space<any>> -> memref<1x128xf32, #tpu.memory_space<any>>
        %c0_i32_37 = arith.constant 0 : i32
        %72 = tpu.memref_slice %arg9[%11, %67, %c0_i32_37] : memref<2x16x128xf32, #tpu.memory_space<vmem>> -> memref<1x1x128xf32, #tpu.memory_space<vmem>>
        %73 = tpu.memref_squeeze %72 : memref<1x1x128xf32, #tpu.memory_space<vmem>> -> memref<1x128xf32, #tpu.memory_space<vmem>>
        %74 = tpu.memref_slice %arg10[%11] : memref<2x!tpu.dma_semaphore, #tpu.memory_space<semaphore_mem>> -> memref<1x!tpu.dma_semaphore, #tpu.memory_space<semaphore_mem>>
        %75 = tpu.memref_squeeze %74 : memref<1x!tpu.dma_semaphore, #tpu.memory_space<semaphore_mem>> -> memref<!tpu.dma_semaphore, #tpu.memory_space<semaphore_mem>>
        tpu.enqueue_dma source(%71 : memref<1x128xf32, #tpu.memory_space<any>>) target(%73 : memref<1x128xf32, #tpu.memory_space<vmem>>) target_semaphore(%75 : memref<!tpu.dma_semaphore, #tpu.memory_space<semaphore_mem>>)
        %c1_i32_38 = arith.constant 1 : i32
        %76 = arith.addi %66, %c1_i32_38 : i32
        %77 = arith.addi %61, %76 : i32
        %78 = arith.index_cast %77 : i32 to index
        %79 = memref.load %arg2[%78] : memref<16xi32, #tpu.memory_space<smem>>
        %c0_i32_39 = arith.constant 0 : i32
        %80 = tpu.memref_slice %arg4[%79, %c0_i32_39] : memref<64x128xf32, #tpu.memory_space<any>> -> memref<1x128xf32, #tpu.memory_space<any>>
        %c0_i32_40 = arith.constant 0 : i32
        %81 = tpu.memref_slice %arg9[%11, %76, %c0_i32_40] : memref<2x16x128xf32, #tpu.memory_space<vmem>> -> memref<1x1x128xf32, #tpu.memory_space<vmem>>
        %82 = tpu.memref_squeeze %81 : memref<1x1x128xf32, #tpu.memory_space<vmem>> -> memref<1x128xf32, #tpu.memory_space<vmem>>
        %83 = tpu.memref_slice %arg10[%11] : memref<2x!tpu.dma_semaphore, #tpu.memory_space<semaphore_mem>> -> memref<1x!tpu.dma_semaphore, #tpu.memory_space<semaphore_mem>>
        %84 = tpu.memref_squeeze %83 : memref<1x!tpu.dma_semaphore, #tpu.memory_space<semaphore_mem>> -> memref<!tpu.dma_semaphore, #tpu.memory_space<semaphore_mem>>
        tpu.enqueue_dma source(%80 : memref<1x128xf32, #tpu.memory_space<any>>) target(%82 : memref<1x128xf32, #tpu.memory_space<vmem>>) target_semaphore(%84 : memref<!tpu.dma_semaphore, #tpu.memory_space<semaphore_mem>>)
        %c2_i32_41 = arith.constant 2 : i32
        %85 = arith.addi %66, %c2_i32_41 : i32
        %86 = arith.addi %61, %85 : i32
        %87 = arith.index_cast %86 : i32 to index
        %88 = memref.load %arg2[%87] : memref<16xi32, #tpu.memory_space<smem>>
        %c0_i32_42 = arith.constant 0 : i32
        %89 = tpu.memref_slice %arg4[%88, %c0_i32_42] : memref<64x128xf32, #tpu.memory_space<any>> -> memref<1x128xf32, #tpu.memory_space<any>>
        %c0_i32_43 = arith.constant 0 : i32
        %90 = tpu.memref_slice %arg9[%11, %85, %c0_i32_43] : memref<2x16x128xf32, #tpu.memory_space<vmem>> -> memref<1x1x128xf32, #tpu.memory_space<vmem>>
        %91 = tpu.memref_squeeze %90 : memref<1x1x128xf32, #tpu.memory_space<vmem>> -> memref<1x128xf32, #tpu.memory_space<vmem>>
        %92 = tpu.memref_slice %arg10[%11] : memref<2x!tpu.dma_semaphore, #tpu.memory_space<semaphore_mem>> -> memref<1x!tpu.dma_semaphore, #tpu.memory_space<semaphore_mem>>
        %93 = tpu.memref_squeeze %92 : memref<1x!tpu.dma_semaphore, #tpu.memory_space<semaphore_mem>> -> memref<!tpu.dma_semaphore, #tpu.memory_space<semaphore_mem>>
        tpu.enqueue_dma source(%89 : memref<1x128xf32, #tpu.memory_space<any>>) target(%91 : memref<1x128xf32, #tpu.memory_space<vmem>>) target_semaphore(%93 : memref<!tpu.dma_semaphore, #tpu.memory_space<semaphore_mem>>)
        %c3_i32 = arith.constant 3 : i32
        %94 = arith.addi %66, %c3_i32 : i32
        %95 = arith.addi %61, %94 : i32
        %96 = arith.index_cast %95 : i32 to index
        %97 = memref.load %arg2[%96] : memref<16xi32, #tpu.memory_space<smem>>
        %c0_i32_44 = arith.constant 0 : i32
        %98 = tpu.memref_slice %arg4[%97, %c0_i32_44] : memref<64x128xf32, #tpu.memory_space<any>> -> memref<1x128xf32, #tpu.memory_space<any>>
        %c0_i32_45 = arith.constant 0 : i32
        %99 = tpu.memref_slice %arg9[%11, %94, %c0_i32_45] : memref<2x16x128xf32, #tpu.memory_space<vmem>> -> memref<1x1x128xf32, #tpu.memory_space<vmem>>
        %100 = tpu.memref_squeeze %99 : memref<1x1x128xf32, #tpu.memory_space<vmem>> -> memref<1x128xf32, #tpu.memory_space<vmem>>
        %101 = tpu.memref_slice %arg10[%11] : memref<2x!tpu.dma_semaphore, #tpu.memory_space<semaphore_mem>> -> memref<1x!tpu.dma_semaphore, #tpu.memory_space<semaphore_mem>>
        %102 = tpu.memref_squeeze %101 : memref<1x!tpu.dma_semaphore, #tpu.memory_space<semaphore_mem>> -> memref<!tpu.dma_semaphore, #tpu.memory_space<semaphore_mem>>
        tpu.enqueue_dma source(%98 : memref<1x128xf32, #tpu.memory_space<any>>) target(%100 : memref<1x128xf32, #tpu.memory_space<vmem>>) target_semaphore(%102 : memref<!tpu.dma_semaphore, #tpu.memory_space<semaphore_mem>>)
        %c4_i32 = arith.constant 4 : i32
        %103 = arith.addi %66, %c4_i32 : i32
        %104 = arith.addi %61, %103 : i32
        %105 = arith.index_cast %104 : i32 to index
        %106 = memref.load %arg2[%105] : memref<16xi32, #tpu.memory_space<smem>>
        %c0_i32_46 = arith.constant 0 : i32
        %107 = tpu.memref_slice %arg4[%106, %c0_i32_46] : memref<64x128xf32, #tpu.memory_space<any>> -> memref<1x128xf32, #tpu.memory_space<any>>
        %c0_i32_47 = arith.constant 0 : i32
        %108 = tpu.memref_slice %arg9[%11, %103, %c0_i32_47] : memref<2x16x128xf32, #tpu.memory_space<vmem>> -> memref<1x1x128xf32, #tpu.memory_space<vmem>>
        %109 = tpu.memref_squeeze %108 : memref<1x1x128xf32, #tpu.memory_space<vmem>> -> memref<1x128xf32, #tpu.memory_space<vmem>>
        %110 = tpu.memref_slice %arg10[%11] : memref<2x!tpu.dma_semaphore, #tpu.memory_space<semaphore_mem>> -> memref<1x!tpu.dma_semaphore, #tpu.memory_space<semaphore_mem>>
        %111 = tpu.memref_squeeze %110 : memref<1x!tpu.dma_semaphore, #tpu.memory_space<semaphore_mem>> -> memref<!tpu.dma_semaphore, #tpu.memory_space<semaphore_mem>>
        tpu.enqueue_dma source(%107 : memref<1x128xf32, #tpu.memory_space<any>>) target(%109 : memref<1x128xf32, #tpu.memory_space<vmem>>) target_semaphore(%111 : memref<!tpu.dma_semaphore, #tpu.memory_space<semaphore_mem>>)
        %c5_i32 = arith.constant 5 : i32
        %112 = arith.addi %66, %c5_i32 : i32
        %113 = arith.addi %61, %112 : i32
        %114 = arith.index_cast %113 : i32 to index
        %115 = memref.load %arg2[%114] : memref<16xi32, #tpu.memory_space<smem>>
        %c0_i32_48 = arith.constant 0 : i32
        %116 = tpu.memref_slice %arg4[%115, %c0_i32_48] : memref<64x128xf32, #tpu.memory_space<any>> -> memref<1x128xf32, #tpu.memory_space<any>>
        %c0_i32_49 = arith.constant 0 : i32
        %117 = tpu.memref_slice %arg9[%11, %112, %c0_i32_49] : memref<2x16x128xf32, #tpu.memory_space<vmem>> -> memref<1x1x128xf32, #tpu.memory_space<vmem>>
        %118 = tpu.memref_squeeze %117 : memref<1x1x128xf32, #tpu.memory_space<vmem>> -> memref<1x128xf32, #tpu.memory_space<vmem>>
        %119 = tpu.memref_slice %arg10[%11] : memref<2x!tpu.dma_semaphore, #tpu.memory_space<semaphore_mem>> -> memref<1x!tpu.dma_semaphore, #tpu.memory_space<semaphore_mem>>
        %120 = tpu.memref_squeeze %119 : memref<1x!tpu.dma_semaphore, #tpu.memory_space<semaphore_mem>> -> memref<!tpu.dma_semaphore, #tpu.memory_space<semaphore_mem>>
        tpu.enqueue_dma source(%116 : memref<1x128xf32, #tpu.memory_space<any>>) target(%118 : memref<1x128xf32, #tpu.memory_space<vmem>>) target_semaphore(%120 : memref<!tpu.dma_semaphore, #tpu.memory_space<semaphore_mem>>)
        %c6_i32 = arith.constant 6 : i32
        %121 = arith.addi %66, %c6_i32 : i32
        %122 = arith.addi %61, %121 : i32
        %123 = arith.index_cast %122 : i32 to index
        %124 = memref.load %arg2[%123] : memref<16xi32, #tpu.memory_space<smem>>
        %c0_i32_50 = arith.constant 0 : i32
        %125 = tpu.memref_slice %arg4[%124, %c0_i32_50] : memref<64x128xf32, #tpu.memory_space<any>> -> memref<1x128xf32, #tpu.memory_space<any>>
        %c0_i32_51 = arith.constant 0 : i32
        %126 = tpu.memref_slice %arg9[%11, %121, %c0_i32_51] : memref<2x16x128xf32, #tpu.memory_space<vmem>> -> memref<1x1x128xf32, #tpu.memory_space<vmem>>
        %127 = tpu.memref_squeeze %126 : memref<1x1x128xf32, #tpu.memory_space<vmem>> -> memref<1x128xf32, #tpu.memory_space<vmem>>
        %128 = tpu.memref_slice %arg10[%11] : memref<2x!tpu.dma_semaphore, #tpu.memory_space<semaphore_mem>> -> memref<1x!tpu.dma_semaphore, #tpu.memory_space<semaphore_mem>>
        %129 = tpu.memref_squeeze %128 : memref<1x!tpu.dma_semaphore, #tpu.memory_space<semaphore_mem>> -> memref<!tpu.dma_semaphore, #tpu.memory_space<semaphore_mem>>
        tpu.enqueue_dma source(%125 : memref<1x128xf32, #tpu.memory_space<any>>) target(%127 : memref<1x128xf32, #tpu.memory_space<vmem>>) target_semaphore(%129 : memref<!tpu.dma_semaphore, #tpu.memory_space<semaphore_mem>>)
        %c7_i32 = arith.constant 7 : i32
        %130 = arith.addi %66, %c7_i32 : i32
        %131 = arith.addi %61, %130 : i32
        %132 = arith.index_cast %131 : i32 to index
        %133 = memref.load %arg2[%132] : memref<16xi32, #tpu.memory_space<smem>>
        %c0_i32_52 = arith.constant 0 : i32
        %134 = tpu.memref_slice %arg4[%133, %c0_i32_52] : memref<64x128xf32, #tpu.memory_space<any>> -> memref<1x128xf32, #tpu.memory_space<any>>
        %c0_i32_53 = arith.constant 0 : i32
        %135 = tpu.memref_slice %arg9[%11, %130, %c0_i32_53] : memref<2x16x128xf32, #tpu.memory_space<vmem>> -> memref<1x1x128xf32, #tpu.memory_space<vmem>>
        %136 = tpu.memref_squeeze %135 : memref<1x1x128xf32, #tpu.memory_space<vmem>> -> memref<1x128xf32, #tpu.memory_space<vmem>>
        %137 = tpu.memref_slice %arg10[%11] : memref<2x!tpu.dma_semaphore, #tpu.memory_space<semaphore_mem>> -> memref<1x!tpu.dma_semaphore, #tpu.memory_space<semaphore_mem>>
        %138 = tpu.memref_squeeze %137 : memref<1x!tpu.dma_semaphore, #tpu.memory_space<semaphore_mem>> -> memref<!tpu.dma_semaphore, #tpu.memory_space<semaphore_mem>>
        tpu.enqueue_dma source(%134 : memref<1x128xf32, #tpu.memory_space<any>>) target(%136 : memref<1x128xf32, #tpu.memory_space<vmem>>) target_semaphore(%138 : memref<!tpu.dma_semaphore, #tpu.memory_space<semaphore_mem>>)
      }
      %c2_i32_32 = arith.constant 2 : i32
    } else {
    }
    %c1_i32_6 = arith.constant 1 : i32
    %15 = arith.addi %arg1, %c1_i32_6 : i32
    %c1_i32_7 = arith.constant 1 : i32
    %16 = arith.cmpi slt, %15, %c1_i32_7 : i32
    %17 = arith.extui %16 : i1 to i32
    %c0_i32_8 = arith.constant 0 : i32
    %18 = arith.cmpi ne, %17, %c0_i32_8 : i32
    scf.if %18 {
      %c1_i32_28 = arith.constant 1 : i32
      %61 = arith.addi %1, %c1_i32_28 : i32
      %c1_i32_29 = arith.constant 1 : i32
      %62 = arith.subi %c1_i32_29, %11 : i32
      %c16_i32_30 = arith.constant 16 : i32
      %63 = arith.muli %61, %c16_i32_30 : i32
      %c0_i32_31 = arith.constant 0 : i32
      %c2_i32_32 = arith.constant 2 : i32
      %64 = arith.addi %c0_i32_31, %c2_i32_32 : i32
      %c1_i32_33 = arith.constant 1 : i32
      scf.for %arg11 = %c0_i32_31 to %64 step %c1_i32_33  : i32 {
        %c1_i32_35 = arith.constant 1 : i32
        %65 = arith.muli %arg11, %c1_i32_35 : i32
        %c0_i32_36 = arith.constant 0 : i32
        %66 = arith.addi %c0_i32_36, %65 : i32
        %c8_i32 = arith.constant 8 : i32
        %67 = arith.muli %66, %c8_i32 : i32
        %68 = tpu.assume_multiple %67, 8 : i32
        %c0_i32_37 = arith.constant 0 : i32
        %69 = arith.addi %68, %c0_i32_37 : i32
        %70 = arith.addi %63, %69 : i32
        %71 = arith.index_cast %70 : i32 to index
        %72 = memref.load %arg2[%71] : memref<16xi32, #tpu.memory_space<smem>>
        %c0_i32_38 = arith.constant 0 : i32
        %73 = tpu.memref_slice %arg4[%72, %c0_i32_38] : memref<64x128xf32, #tpu.memory_space<any>> -> memref<1x128xf32, #tpu.memory_space<any>>
        %c0_i32_39 = arith.constant 0 : i32
        %74 = tpu.memref_slice %arg9[%62, %69, %c0_i32_39] : memref<2x16x128xf32, #tpu.memory_space<vmem>> -> memref<1x1x128xf32, #tpu.memory_space<vmem>>
        %75 = tpu.memref_squeeze %74 : memref<1x1x128xf32, #tpu.memory_space<vmem>> -> memref<1x128xf32, #tpu.memory_space<vmem>>
        %76 = tpu.memref_slice %arg10[%62] : memref<2x!tpu.dma_semaphore, #tpu.memory_space<semaphore_mem>> -> memref<1x!tpu.dma_semaphore, #tpu.memory_space<semaphore_mem>>
        %77 = tpu.memref_squeeze %76 : memref<1x!tpu.dma_semaphore, #tpu.memory_space<semaphore_mem>> -> memref<!tpu.dma_semaphore, #tpu.memory_space<semaphore_mem>>
        tpu.enqueue_dma source(%73 : memref<1x128xf32, #tpu.memory_space<any>>) target(%75 : memref<1x128xf32, #tpu.memory_space<vmem>>) target_semaphore(%77 : memref<!tpu.dma_semaphore, #tpu.memory_space<semaphore_mem>>)
        %c1_i32_40 = arith.constant 1 : i32
        %78 = arith.addi %68, %c1_i32_40 : i32
        %79 = arith.addi %63, %78 : i32
        %80 = arith.index_cast %79 : i32 to index
        %81 = memref.load %arg2[%80] : memref<16xi32, #tpu.memory_space<smem>>
        %c0_i32_41 = arith.constant 0 : i32
        %82 = tpu.memref_slice %arg4[%81, %c0_i32_41] : memref<64x128xf32, #tpu.memory_space<any>> -> memref<1x128xf32, #tpu.memory_space<any>>
        %c0_i32_42 = arith.constant 0 : i32
        %83 = tpu.memref_slice %arg9[%62, %78, %c0_i32_42] : memref<2x16x128xf32, #tpu.memory_space<vmem>> -> memref<1x1x128xf32, #tpu.memory_space<vmem>>
        %84 = tpu.memref_squeeze %83 : memref<1x1x128xf32, #tpu.memory_space<vmem>> -> memref<1x128xf32, #tpu.memory_space<vmem>>
        %85 = tpu.memref_slice %arg10[%62] : memref<2x!tpu.dma_semaphore, #tpu.memory_space<semaphore_mem>> -> memref<1x!tpu.dma_semaphore, #tpu.memory_space<semaphore_mem>>
        %86 = tpu.memref_squeeze %85 : memref<1x!tpu.dma_semaphore, #tpu.memory_space<semaphore_mem>> -> memref<!tpu.dma_semaphore, #tpu.memory_space<semaphore_mem>>
        tpu.enqueue_dma source(%82 : memref<1x128xf32, #tpu.memory_space<any>>) target(%84 : memref<1x128xf32, #tpu.memory_space<vmem>>) target_semaphore(%86 : memref<!tpu.dma_semaphore, #tpu.memory_space<semaphore_mem>>)
        %c2_i32_43 = arith.constant 2 : i32
        %87 = arith.addi %68, %c2_i32_43 : i32
        %88 = arith.addi %63, %87 : i32
        %89 = arith.index_cast %88 : i32 to index
        %90 = memref.load %arg2[%89] : memref<16xi32, #tpu.memory_space<smem>>
        %c0_i32_44 = arith.constant 0 : i32
        %91 = tpu.memref_slice %arg4[%90, %c0_i32_44] : memref<64x128xf32, #tpu.memory_space<any>> -> memref<1x128xf32, #tpu.memory_space<any>>
        %c0_i32_45 = arith.constant 0 : i32
        %92 = tpu.memref_slice %arg9[%62, %87, %c0_i32_45] : memref<2x16x128xf32, #tpu.memory_space<vmem>> -> memref<1x1x128xf32, #tpu.memory_space<vmem>>
        %93 = tpu.memref_squeeze %92 : memref<1x1x128xf32, #tpu.memory_space<vmem>> -> memref<1x128xf32, #tpu.memory_space<vmem>>
        %94 = tpu.memref_slice %arg10[%62] : memref<2x!tpu.dma_semaphore, #tpu.memory_space<semaphore_mem>> -> memref<1x!tpu.dma_semaphore, #tpu.memory_space<semaphore_mem>>
        %95 = tpu.memref_squeeze %94 : memref<1x!tpu.dma_semaphore, #tpu.memory_space<semaphore_mem>> -> memref<!tpu.dma_semaphore, #tpu.memory_space<semaphore_mem>>
        tpu.enqueue_dma source(%91 : memref<1x128xf32, #tpu.memory_space<any>>) target(%93 : memref<1x128xf32, #tpu.memory_space<vmem>>) target_semaphore(%95 : memref<!tpu.dma_semaphore, #tpu.memory_space<semaphore_mem>>)
        %c3_i32 = arith.constant 3 : i32
        %96 = arith.addi %68, %c3_i32 : i32
        %97 = arith.addi %63, %96 : i32
        %98 = arith.index_cast %97 : i32 to index
        %99 = memref.load %arg2[%98] : memref<16xi32, #tpu.memory_space<smem>>
        %c0_i32_46 = arith.constant 0 : i32
        %100 = tpu.memref_slice %arg4[%99, %c0_i32_46] : memref<64x128xf32, #tpu.memory_space<any>> -> memref<1x128xf32, #tpu.memory_space<any>>
        %c0_i32_47 = arith.constant 0 : i32
        %101 = tpu.memref_slice %arg9[%62, %96, %c0_i32_47] : memref<2x16x128xf32, #tpu.memory_space<vmem>> -> memref<1x1x128xf32, #tpu.memory_space<vmem>>
        %102 = tpu.memref_squeeze %101 : memref<1x1x128xf32, #tpu.memory_space<vmem>> -> memref<1x128xf32, #tpu.memory_space<vmem>>
        %103 = tpu.memref_slice %arg10[%62] : memref<2x!tpu.dma_semaphore, #tpu.memory_space<semaphore_mem>> -> memref<1x!tpu.dma_semaphore, #tpu.memory_space<semaphore_mem>>
        %104 = tpu.memref_squeeze %103 : memref<1x!tpu.dma_semaphore, #tpu.memory_space<semaphore_mem>> -> memref<!tpu.dma_semaphore, #tpu.memory_space<semaphore_mem>>
        tpu.enqueue_dma source(%100 : memref<1x128xf32, #tpu.memory_space<any>>) target(%102 : memref<1x128xf32, #tpu.memory_space<vmem>>) target_semaphore(%104 : memref<!tpu.dma_semaphore, #tpu.memory_space<semaphore_mem>>)
        %c4_i32 = arith.constant 4 : i32
        %105 = arith.addi %68, %c4_i32 : i32
        %106 = arith.addi %63, %105 : i32
        %107 = arith.index_cast %106 : i32 to index
        %108 = memref.load %arg2[%107] : memref<16xi32, #tpu.memory_space<smem>>
        %c0_i32_48 = arith.constant 0 : i32
        %109 = tpu.memref_slice %arg4[%108, %c0_i32_48] : memref<64x128xf32, #tpu.memory_space<any>> -> memref<1x128xf32, #tpu.memory_space<any>>
        %c0_i32_49 = arith.constant 0 : i32
        %110 = tpu.memref_slice %arg9[%62, %105, %c0_i32_49] : memref<2x16x128xf32, #tpu.memory_space<vmem>> -> memref<1x1x128xf32, #tpu.memory_space<vmem>>
        %111 = tpu.memref_squeeze %110 : memref<1x1x128xf32, #tpu.memory_space<vmem>> -> memref<1x128xf32, #tpu.memory_space<vmem>>
        %112 = tpu.memref_slice %arg10[%62] : memref<2x!tpu.dma_semaphore, #tpu.memory_space<semaphore_mem>> -> memref<1x!tpu.dma_semaphore, #tpu.memory_space<semaphore_mem>>
        %113 = tpu.memref_squeeze %112 : memref<1x!tpu.dma_semaphore, #tpu.memory_space<semaphore_mem>> -> memref<!tpu.dma_semaphore, #tpu.memory_space<semaphore_mem>>
        tpu.enqueue_dma source(%109 : memref<1x128xf32, #tpu.memory_space<any>>) target(%111 : memref<1x128xf32, #tpu.memory_space<vmem>>) target_semaphore(%113 : memref<!tpu.dma_semaphore, #tpu.memory_space<semaphore_mem>>)
        %c5_i32 = arith.constant 5 : i32
        %114 = arith.addi %68, %c5_i32 : i32
        %115 = arith.addi %63, %114 : i32
        %116 = arith.index_cast %115 : i32 to index
        %117 = memref.load %arg2[%116] : memref<16xi32, #tpu.memory_space<smem>>
        %c0_i32_50 = arith.constant 0 : i32
        %118 = tpu.memref_slice %arg4[%117, %c0_i32_50] : memref<64x128xf32, #tpu.memory_space<any>> -> memref<1x128xf32, #tpu.memory_space<any>>
        %c0_i32_51 = arith.constant 0 : i32
        %119 = tpu.memref_slice %arg9[%62, %114, %c0_i32_51] : memref<2x16x128xf32, #tpu.memory_space<vmem>> -> memref<1x1x128xf32, #tpu.memory_space<vmem>>
        %120 = tpu.memref_squeeze %119 : memref<1x1x128xf32, #tpu.memory_space<vmem>> -> memref<1x128xf32, #tpu.memory_space<vmem>>
        %121 = tpu.memref_slice %arg10[%62] : memref<2x!tpu.dma_semaphore, #tpu.memory_space<semaphore_mem>> -> memref<1x!tpu.dma_semaphore, #tpu.memory_space<semaphore_mem>>
        %122 = tpu.memref_squeeze %121 : memref<1x!tpu.dma_semaphore, #tpu.memory_space<semaphore_mem>> -> memref<!tpu.dma_semaphore, #tpu.memory_space<semaphore_mem>>
        tpu.enqueue_dma source(%118 : memref<1x128xf32, #tpu.memory_space<any>>) target(%120 : memref<1x128xf32, #tpu.memory_space<vmem>>) target_semaphore(%122 : memref<!tpu.dma_semaphore, #tpu.memory_space<semaphore_mem>>)
        %c6_i32 = arith.constant 6 : i32
        %123 = arith.addi %68, %c6_i32 : i32
        %124 = arith.addi %63, %123 : i32
        %125 = arith.index_cast %124 : i32 to index
        %126 = memref.load %arg2[%125] : memref<16xi32, #tpu.memory_space<smem>>
        %c0_i32_52 = arith.constant 0 : i32
        %127 = tpu.memref_slice %arg4[%126, %c0_i32_52] : memref<64x128xf32, #tpu.memory_space<any>> -> memref<1x128xf32, #tpu.memory_space<any>>
        %c0_i32_53 = arith.constant 0 : i32
        %128 = tpu.memref_slice %arg9[%62, %123, %c0_i32_53] : memref<2x16x128xf32, #tpu.memory_space<vmem>> -> memref<1x1x128xf32, #tpu.memory_space<vmem>>
        %129 = tpu.memref_squeeze %128 : memref<1x1x128xf32, #tpu.memory_space<vmem>> -> memref<1x128xf32, #tpu.memory_space<vmem>>
        %130 = tpu.memref_slice %arg10[%62] : memref<2x!tpu.dma_semaphore, #tpu.memory_space<semaphore_mem>> -> memref<1x!tpu.dma_semaphore, #tpu.memory_space<semaphore_mem>>
        %131 = tpu.memref_squeeze %130 : memref<1x!tpu.dma_semaphore, #tpu.memory_space<semaphore_mem>> -> memref<!tpu.dma_semaphore, #tpu.memory_space<semaphore_mem>>
        tpu.enqueue_dma source(%127 : memref<1x128xf32, #tpu.memory_space<any>>) target(%129 : memref<1x128xf32, #tpu.memory_space<vmem>>) target_semaphore(%131 : memref<!tpu.dma_semaphore, #tpu.memory_space<semaphore_mem>>)
        %c7_i32 = arith.constant 7 : i32
        %132 = arith.addi %68, %c7_i32 : i32
        %133 = arith.addi %63, %132 : i32
        %134 = arith.index_cast %133 : i32 to index
        %135 = memref.load %arg2[%134] : memref<16xi32, #tpu.memory_space<smem>>
        %c0_i32_54 = arith.constant 0 : i32
        %136 = tpu.memref_slice %arg4[%135, %c0_i32_54] : memref<64x128xf32, #tpu.memory_space<any>> -> memref<1x128xf32, #tpu.memory_space<any>>
        %c0_i32_55 = arith.constant 0 : i32
        %137 = tpu.memref_slice %arg9[%62, %132, %c0_i32_55] : memref<2x16x128xf32, #tpu.memory_space<vmem>> -> memref<1x1x128xf32, #tpu.memory_space<vmem>>
        %138 = tpu.memref_squeeze %137 : memref<1x1x128xf32, #tpu.memory_space<vmem>> -> memref<1x128xf32, #tpu.memory_space<vmem>>
        %139 = tpu.memref_slice %arg10[%62] : memref<2x!tpu.dma_semaphore, #tpu.memory_space<semaphore_mem>> -> memref<1x!tpu.dma_semaphore, #tpu.memory_space<semaphore_mem>>
        %140 = tpu.memref_squeeze %139 : memref<1x!tpu.dma_semaphore, #tpu.memory_space<semaphore_mem>> -> memref<!tpu.dma_semaphore, #tpu.memory_space<semaphore_mem>>
        tpu.enqueue_dma source(%136 : memref<1x128xf32, #tpu.memory_space<any>>) target(%138 : memref<1x128xf32, #tpu.memory_space<vmem>>) target_semaphore(%140 : memref<!tpu.dma_semaphore, #tpu.memory_space<semaphore_mem>>)
      }
      %c2_i32_34 = arith.constant 2 : i32
    } else {
    }
    %c0_i32_9 = arith.constant 0 : i32
    %c16_i32 = arith.constant 16 : i32
    %19 = arith.addi %c0_i32_9, %c16_i32 : i32
    %c1_i32_10 = arith.constant 1 : i32
    scf.for %arg11 = %c0_i32_9 to %19 step %c1_i32_10  : i32 {
      %c1_i32_28 = arith.constant 1 : i32
      %61 = arith.muli %arg11, %c1_i32_28 : i32
      %c0_i32_29 = arith.constant 0 : i32
      %62 = arith.addi %c0_i32_29, %61 : i32
      %c0_i32_30 = arith.constant 0 : i32
      %c0_i32_31 = arith.constant 0 : i32
      %63 = tpu.memref_slice %arg4[%c0_i32_30, %c0_i32_31] : memref<64x128xf32, #tpu.memory_space<any>> -> memref<1x128xf32, #tpu.memory_space<any>>
      %c0_i32_32 = arith.constant 0 : i32
      %64 = tpu.memref_slice %arg9[%11, %62, %c0_i32_32] : memref<2x16x128xf32, #tpu.memory_space<vmem>> -> memref<1x1x128xf32, #tpu.memory_space<vmem>>
      %65 = tpu.memref_squeeze %64 : memref<1x1x128xf32, #tpu.memory_space<vmem>> -> memref<1x128xf32, #tpu.memory_space<vmem>>
      %66 = tpu.memref_slice %arg10[%11] : memref<2x!tpu.dma_semaphore, #tpu.memory_space<semaphore_mem>> -> memref<1x!tpu.dma_semaphore, #tpu.memory_space<semaphore_mem>>
      %67 = tpu.memref_squeeze %66 : memref<1x!tpu.dma_semaphore, #tpu.memory_space<semaphore_mem>> -> memref<!tpu.dma_semaphore, #tpu.memory_space<semaphore_mem>>
      tpu.wait_dma2 semaphore(%67 : memref<!tpu.dma_semaphore, #tpu.memory_space<semaphore_mem>>) src(%63 : memref<1x128xf32, #tpu.memory_space<any>>) dst(%65 : memref<1x128xf32, #tpu.memory_space<vmem>>)
    }
    %c16_i32_11 = arith.constant 16 : i32
    %20 = arith.index_cast %11 : i32 to index
    %c0 = arith.constant 0 : index
    %c0_12 = arith.constant 0 : index
    %21 = vector.load %arg9[%20, %c0, %c0_12] : memref<2x16x128xf32, #tpu.memory_space<vmem>>, vector<1x16x128xf32>
    %22 = vector.shape_cast %21 : vector<1x16x128xf32> to vector<16x128xf32>
    %c0_13 = arith.constant 0 : index
    %c0_14 = arith.constant 0 : index
    %23 = vector.load %arg3[%c0_13, %c0_14] : memref<16x1xf32, #tpu.memory_space<vmem>>, vector<16x1xf32>
    %c0_15 = arith.constant 0 : index
    %c0_16 = arith.constant 0 : index
    %24 = vector.load %arg5[%c0_15, %c0_16] : memref<2x128xf32, #tpu.memory_space<vmem>>, vector<2x128xf32>
    %25 = vector.extract_strided_slice %24 {offsets = [0, 0], sizes = [1, 128], strides = [1, 1]} : vector<2x128xf32> to vector<1x128xf32>
    %26 = vector.extract_strided_slice %24 {offsets = [1, 0], sizes = [1, 128], strides = [1, 1]} : vector<2x128xf32> to vector<1x128xf32>
    %27 = arith.subf %26, %25 : vector<1x128xf32>
    %28 = vector.broadcast %23 : vector<16x1xf32> to vector<16x128xf32>
    %29 = vector.broadcast %27 : vector<1x128xf32> to vector<16x128xf32>
    %30 = arith.mulf %28, %29 : vector<16x128xf32>
    %31 = vector.broadcast %25 : vector<1x128xf32> to vector<16x128xf32>
    %32 = arith.addf %31, %30 : vector<16x128xf32>
    %33 = arith.addf %22, %32 : vector<16x128xf32>
    %cst = arith.constant dense<0.000000e+00> : vector<16xf32>
    %34 = vector.multi_reduction <add>, %33, %cst [1] : vector<16x128xf32> to vector<16xf32>
    %35 = vector.shape_cast %34 : vector<16xf32> to vector<16x1xf32>
    %cst_17 = arith.constant 7.812500e-03 : f32
    %36 = vector.broadcast %cst_17 : f32 to vector<16x1xf32>
    %37 = arith.mulf %35, %36 : vector<16x1xf32>
    %38 = arith.mulf %33, %33 : vector<16x128xf32>
    %cst_18 = arith.constant dense<0.000000e+00> : vector<16xf32>
    %39 = vector.multi_reduction <add>, %38, %cst_18 [1] : vector<16x128xf32> to vector<16xf32>
    %40 = vector.shape_cast %39 : vector<16xf32> to vector<16x1xf32>
    %cst_19 = arith.constant 7.812500e-03 : f32
    %41 = vector.broadcast %cst_19 : f32 to vector<16x1xf32>
    %42 = arith.mulf %40, %41 : vector<16x1xf32>
    %43 = arith.mulf %37, %37 : vector<16x1xf32>
    %44 = arith.subf %42, %43 : vector<16x1xf32>
    %cst_20 = arith.constant 0.000000e+00 : f32
    %45 = vector.broadcast %cst_20 : f32 to vector<16x1xf32>
    %46 = arith.maximumf %44, %45 : vector<16x1xf32>
    %cst_21 = arith.constant 9.99999996E-13 : f32
    %47 = vector.broadcast %cst_21 : f32 to vector<16x1xf32>
    %48 = arith.addf %46, %47 : vector<16x1xf32>
    %49 = math.rsqrt %48 : vector<16x1xf32>
    %c0_22 = arith.constant 0 : index
    %c0_23 = arith.constant 0 : index
    %50 = vector.load %arg6[%c0_22, %c0_23] : memref<1x128xf32, #tpu.memory_space<vmem>>, vector<1x128xf32>
    %c0_24 = arith.constant 0 : index
    %c0_25 = arith.constant 0 : index
    %51 = vector.load %arg7[%c0_24, %c0_25] : memref<1x128xf32, #tpu.memory_space<vmem>>, vector<1x128xf32>
    %52 = vector.broadcast %37 : vector<16x1xf32> to vector<16x128xf32>
    %53 = arith.subf %33, %52 : vector<16x128xf32>
    %54 = vector.broadcast %49 : vector<16x1xf32> to vector<16x128xf32>
    %55 = arith.mulf %53, %54 : vector<16x128xf32>
    %56 = vector.broadcast %50 : vector<1x128xf32> to vector<16x128xf32>
    %57 = arith.mulf %55, %56 : vector<16x128xf32>
    %58 = vector.broadcast %51 : vector<1x128xf32> to vector<16x128xf32>
    %59 = arith.addf %57, %58 : vector<16x128xf32>
    %c0_26 = arith.constant 0 : index
    %c0_27 = arith.constant 0 : index
    %60 = vector.load %arg8[%c0_26, %c0_27] : memref<16x128xf32, #tpu.memory_space<vmem>>, vector<16x128xf32>
    tpu.vector_store %arg8[%c0_26, %c0_27], %59 {strides = array<i32>} : memref<16x128xf32, #tpu.memory_space<vmem>>, vector<16x128xf32>,
    return
  }
  func.func @transform_0(%arg0: i32, %arg1: i32, %arg2: memref<16xi32, #tpu.memory_space<smem>>) -> (i32, i32) {
    %c1_i32 = arith.constant 1 : i32
    %0 = arith.muli %arg0, %c1_i32 : i32
    %1 = arith.addi %0, %arg1 : i32
    %c0_i32 = arith.constant 0 : i32
    %c0_i32_0 = arith.constant 0 : i32
    return %1, %c0_i32 : i32, i32
  }
  func.func @transform_2(%arg0: i32, %arg1: i32, %arg2: memref<16xi32, #tpu.memory_space<smem>>) -> (i32, i32) {
    %c0_i32 = arith.constant 0 : i32
    %c0_i32_0 = arith.constant 0 : i32
    %c0_i32_1 = arith.constant 0 : i32
    return %c0_i32, %c0_i32_0 : i32, i32
  }
  func.func @transform_3(%arg0: i32, %arg1: i32, %arg2: memref<16xi32, #tpu.memory_space<smem>>) -> (i32, i32) {
    %c0_i32 = arith.constant 0 : i32
    %c0_i32_0 = arith.constant 0 : i32
    %c0_i32_1 = arith.constant 0 : i32
    return %c0_i32, %c0_i32_0 : i32, i32
  }
  func.func @transform_4(%arg0: i32, %arg1: i32, %arg2: memref<16xi32, #tpu.memory_space<smem>>) -> (i32, i32) {
    %c0_i32 = arith.constant 0 : i32
    %c0_i32_0 = arith.constant 0 : i32
    %c0_i32_1 = arith.constant 0 : i32
    return %c0_i32, %c0_i32_0 : i32, i32
  }
  func.func @transform_5(%arg0: i32, %arg1: i32, %arg2: memref<16xi32, #tpu.memory_space<smem>>) -> (i32, i32) {
    %c1_i32 = arith.constant 1 : i32
    %0 = arith.muli %arg0, %c1_i32 : i32
    %1 = arith.addi %0, %arg1 : i32
    %c0_i32 = arith.constant 0 : i32
    %c0_i32_0 = arith.constant 0 : i32
    return %1, %c0_i32 : i32, i32
  }
}

</mosaic_0001>

<bundles_post_ra>
// kernel: tpu_custom_call.1
= control target key start
LH: loop header
LB: loop body
LE: loop exit
PB: predicated region body
PF: predicated region fallthrough
CT: control target
= control target key end

     0   :  { %s1201_s0 = inlined_call_operand.vmem [shape: s32[16], index: 0, kind: input, shape index: {}]   ;;  %s1202_s1 = inlined_call_operand.vmem [shape: f32[16,1], index: 1, kind: input, shape index: {}]   ;;  %s1203_s2 = inlined_call_operand.hbm [shape: f32[64,128], index: 2, kind: input, shape index: {}]   ;;  %s1204_s3 = inlined_call_operand.vmem [shape: f32[2,128], index: 3, kind: input, shape index: {}]   ;;  %s1205_s4 = inlined_call_operand.vmem [shape: f32[1,128], index: 4, kind: input, shape index: {}]   ;;  %s1206_s5 = inlined_call_operand.vmem [shape: f32[1,128], index: 5, kind: input, shape index: {}]   ;;  %s1207_s6 = inlined_call_operand.hbm [shape: f32[16,128], index: 6, kind: output, shape index: {}]  }
   0x1   :  { %s11_s23 = sshll.u32 %s1201_s0, 4  ;;  %s12_s23 = int_to_ptr.vmem [resolvable:$true] %s11_s23 }
   0x2   :  { %s731_s24 = scalar_lea.vmem %s12_s23, 16  ;;  %p736_p1 = scmp.lt.s32.totalorder %s12_s23, %s12_s23 }
   0x3   :  { %p732_p0 = scmp.ne.s32.totalorder %s12_s23, %s731_s24  ;;  %p737_p2 = scmp.lt.s32.totalorder %s731_s24, %s731_s24 }
   0x5   :  { %p738_p3 = por %p737_p2, %p736_p1 }
   0x7   :  { %p739_p4 = pnand %p738_p3, %p732_p0 }
   0x9   :  { %742 = shalt.err (!%p739_p4)  }
   0xa   :  { %s979_s25 = smov [#allocation5]  }
   0xb   :  { %14 = dma.vmem_to_smem %s12_s23, 16, %s979_s25, [#allocation4] }
   0xc   :  { %965 = dma.done.wait [#allocation4], 16 }
   0xd   :  { %966 = vsyncadd [#allocation4], 4294967280 }
   0xe   :  { %16 = sfence }
   0xf   :  { %17 = vsyncpa [#allocation7], 0  ;;  %s1023_s26 = smov 0  }
  0x10 LB: > { %s1029_s0 = sshll.u32 %s973_s26, 3  ;;  %s1056_s21 = scalar_lea.hbm %s1203_s2, 1024  ;;  %s973_s26 = sphi %s1023_s26, %s69_s26  }
  0x11   : > { %s72_s27 = sld [smem:[#allocation5 + %s1029_s0]]  ;;  %s1033_s28 = scalar_lea.vmem [#allocation2], %s1029_s0 }
  0x12   : > { %s86_s29 = sshll.u32 %s1033_s28, 4  ;;  %s90_s30 = sadd.s32 1, %s1029_s0  ;;  %s1037_s29 = int_to_ptr.vmem [resolvable:$true] %s86_s29 }
  0x13   : > { %s1039_s7 = sld [smem:[#allocation5 + %s90_s30]]  ;;  %s521_s8 = scalar_lea.vmem %s1033_s28, 1 [#allocation2] }
  0x14   : > { %s108_s9 = sadd.s32 2, %s1029_s0  ;;  %s104_s10 = sshll.u32 %s521_s8, 4  ;;  %s1045_s10 = int_to_ptr.vmem [resolvable:$true] %s104_s10 }
  0x15   : > { %s1043_s11 = sld [smem:[#allocation5 + %s108_s9]]  ;;  %s528_s12 = scalar_lea.vmem %s1033_s28, 2 [#allocation2] }
  0x16   : > { %s122_s14 = sshll.u32 %s528_s12, 4  ;;  %s1051_s14 = int_to_ptr.vmem [resolvable:$true] %s122_s14 }
  0x17   : > { %s639_s13 = sshll.u32 %s72_s27, 4 }
  0x18   : > { %s74_s17 = scalar_lea.hbm %s1203_s2, %s639_s13 }
  0x19   : > { %s743_s18 = scalar_lea.hbm %s74_s17, 16  ;;  %p746_p6 = scmp.lt.u32.totalorder %s74_s17, %s1203_s2 }
  0x1a   : > { %p744_p5 = scmp.ne.s32.totalorder %s74_s17, %s743_s18  ;;  %p747_p7 = scmp.lt.u32.totalorder %s1056_s21, %s743_s18 }
  0x1b   : > { %p749_p9 = scmp.lt.u32.totalorder %s743_s18, %s74_s17 }
  0x1c   : > { %p748_p8 = por %p747_p7, %p746_p6 }
  0x1e   : > { %p750_p10 = por %p749_p9, %p748_p8 }
  0x20   : > { %p751_p11 = pnand %p750_p10, %p744_p5 }
  0x22   : > { %754 = shalt.err (!%p751_p11)  }
  0x23   : > { %s755_s24 = scalar_lea.vmem %s1037_s29, 16  ;;  %s980_s25 = smov [#allocation2]  }
  0x24   : > { %p756_p12 = scmp.ne.s32.totalorder %s1037_s29, %s755_s24  ;;  %s757_s27 = sshll.u32 %s980_s25, 4  ;;  %s1064_s27 = int_to_ptr.vmem [resolvable:$false] %s757_s27 }
  0x25   : > { %s1067_s30 = scalar_lea.vmem %s1064_s27, 512  ;;  %p760_p13 = scmp.lt.s32.totalorder %s1037_s29, %s1064_s27 }
  0x26   : > { %p761_p0 = scmp.lt.s32.totalorder %s1067_s30, %s755_s24 }
  0x28   : > { %p762_p1 = por %p761_p0, %p760_p13 }
  0x2a   : > { %p763_p2 = pnand %p762_p1, %p756_p12 }
  0x2c   : > { %766 = shalt.err (!%p763_p2)  }
  0x2d   : > { %89 = dma.hbm_to_vmem [thread:$0]  %s74_s17, 16, %s1037_s29, [#allocation3] }
  0x2e   : > { %s640_s8 = sshll.u32 %s1039_s7, 4  ;;  %s126_s9 = sadd.s32 3, %s1029_s0 }
  0x2f   : > { %s94_s15 = scalar_lea.hbm %s1203_s2, %s640_s8  ;;  %s642_s16 = sshll.u32 %s1043_s11, 4 }
  0x30   : > { %s767_s18 = scalar_lea.hbm %s94_s15, 16  ;;  %p770_p4 = scmp.lt.u32.totalorder %s94_s15, %s1203_s2 }
  0x31   : > { %p768_p3 = scmp.ne.s32.totalorder %s94_s15, %s767_s18  ;;  %p771_p5 = scmp.lt.u32.totalorder %s1056_s21, %s767_s18 }
  0x32   : > { %p773_p7 = scmp.lt.u32.totalorder %s767_s18, %s94_s15 }
  0x33   : > { %p772_p6 = por %p771_p5, %p770_p4 }
  0x35   : > { %p774_p8 = por %p773_p7, %p772_p6 }
  0x37   : > { %p775_p9 = pnand %p774_p8, %p768_p3 }
  0x39   : > { %778 = shalt.err (!%p775_p9)  }
  0x3a   : > { %s779_s29 = scalar_lea.vmem %s1045_s10, 16  ;;  %p784_p11 = scmp.lt.s32.totalorder %s1045_s10, %s1064_s27 }
  0x3b   : > { %p780_p10 = scmp.ne.s32.totalorder %s1045_s10, %s779_s29  ;;  %p785_p12 = scmp.lt.s32.totalorder %s1067_s30, %s779_s29 }
  0x3d   : > { %p786_p13 = por %p785_p12, %p784_p11 }
  0x3f   : > { %p787_p0 = pnand %p786_p13, %p780_p10 }
  0x41   : > { %790 = shalt.err (!%p787_p0)  }
  0x42   : > { %107 = dma.hbm_to_vmem [thread:$0]  %s94_s15, 16, %s1045_s10, [#allocation3] }
  0x43   : > { %s112_s17 = scalar_lea.hbm %s1203_s2, %s642_s16  ;;  %s1092_s22 = sld [smem:[#allocation5 + %s126_s9]] }
  0x44   : > { %s791_s23 = scalar_lea.hbm %s112_s17, 16  ;;  %p794_p2 = scmp.lt.u32.totalorder %s112_s17, %s1203_s2 }
  0x45   : > { %p792_p1 = scmp.ne.s32.totalorder %s112_s17, %s791_s23  ;;  %p795_p3 = scmp.lt.u32.totalorder %s1056_s21, %s791_s23 }
  0x46   : > { %p797_p5 = scmp.lt.u32.totalorder %s791_s23, %s112_s17 }
  0x47   : > { %p796_p4 = por %p795_p3, %p794_p2 }
  0x49   : > { %p798_p6 = por %p797_p5, %p796_p4 }
  0x4b   : > { %p799_p7 = pnand %p798_p6, %p792_p1 }
  0x4d   : > { %802 = shalt.err (!%p799_p7)  }
  0x4e   : > { %s803_s10 = scalar_lea.vmem %s1051_s14, 16  ;;  %p808_p9 = scmp.lt.s32.totalorder %s1051_s14, %s1064_s27 }
  0x4f   : > { %p804_p8 = scmp.ne.s32.totalorder %s1051_s14, %s803_s10  ;;  %p809_p10 = scmp.lt.s32.totalorder %s1067_s30, %s803_s10 }
  0x51   : > { %p810_p11 = por %p809_p10, %p808_p9 }
  0x53   : > { %p811_p12 = pnand %p810_p11, %p804_p8 }
  0x55   : > { %814 = shalt.err (!%p811_p12)  }
  0x56   : > { %125 = dma.hbm_to_vmem [thread:$0]  %s112_s17, 16, %s1051_s14, [#allocation3] }
  0x57   : > { %s535_s8 = scalar_lea.vmem %s1033_s28, 3 [#allocation2]  ;;  %s144_s9 = sadd.s32 4, %s1029_s0 }
  0x58   : > { %s140_s12 = sshll.u32 %s535_s8, 4  ;;  %s1106_s13 = sld [smem:[#allocation5 + %s144_s9]]  ;;  %s141_s12 = int_to_ptr.vmem [resolvable:$true] %s140_s12 }
  0x59   : > { %s542_s15 = scalar_lea.vmem %s1033_s28, 4 [#allocation2]  ;;  %s162_s18 = sadd.s32 5, %s1029_s0 }
  0x5a   : > { %s158_s16 = sshll.u32 %s542_s15, 4  ;;  %s644_s19 = sshll.u32 %s1092_s22, 4  ;;  %s1111_s16 = int_to_ptr.vmem [resolvable:$true] %s158_s16 }
  0x5b   : > { %s130_s7 = scalar_lea.hbm %s1203_s2, %s644_s19  ;;  %s1116_s11 = sld [smem:[#allocation5 + %s162_s18]] }
  0x5c   : > { %s815_s14 = scalar_lea.hbm %s130_s7, 16  ;;  %p818_p0 = scmp.lt.u32.totalorder %s130_s7, %s1203_s2 }
  0x5d   : > { %p816_p13 = scmp.ne.s32.totalorder %s130_s7, %s815_s14  ;;  %p819_p1 = scmp.lt.u32.totalorder %s1056_s21, %s815_s14 }
  0x5e   : > { %p821_p3 = scmp.lt.u32.totalorder %s815_s14, %s130_s7 }
  0x5f   : > { %p820_p2 = por %p819_p1, %p818_p0 }
  0x61   : > { %p822_p4 = por %p821_p3, %p820_p2 }
  0x63   : > { %p823_p5 = pnand %p822_p4, %p816_p13 }
  0x65   : > { %826 = shalt.err (!%p823_p5)  }
  0x66   : > { %s827_s22 = scalar_lea.vmem %s141_s12, 16  ;;  %p832_p7 = scmp.lt.s32.totalorder %s141_s12, %s1064_s27 }
  0x67   : > { %p828_p6 = scmp.ne.s32.totalorder %s141_s12, %s827_s22  ;;  %p833_p8 = scmp.lt.s32.totalorder %s1067_s30, %s827_s22 }
  0x69   : > { %p834_p9 = por %p833_p8, %p832_p7 }
  0x6b   : > { %p835_p10 = pnand %p834_p9, %p828_p6 }
  0x6d   : > { %838 = shalt.err (!%p835_p10)  }
  0x6e   : > { %143 = dma.hbm_to_vmem [thread:$0]  %s130_s7, 16, %s141_s12, [#allocation3] }
  0x6f   : > { %s646_s24 = sshll.u32 %s1106_s13, 4  ;;  %s549_s25 = scalar_lea.vmem %s1033_s28, 5 [#allocation2] }
  0x70   : > { %s148_s9 = scalar_lea.hbm %s1203_s2, %s646_s24  ;;  %s176_s15 = sshll.u32 %s549_s25, 4  ;;  %s177_s15 = int_to_ptr.vmem [resolvable:$true] %s176_s15 }
  0x71   : > { %s839_s18 = scalar_lea.hbm %s148_s9, 16  ;;  %p842_p12 = scmp.lt.u32.totalorder %s148_s9, %s1203_s2 }
  0x72   : > { %p840_p11 = scmp.ne.s32.totalorder %s148_s9, %s839_s18  ;;  %p843_p13 = scmp.lt.u32.totalorder %s1056_s21, %s839_s18 }
  0x73   : > { %p845_p1 = scmp.lt.u32.totalorder %s839_s18, %s148_s9 }
  0x74   : > { %p844_p0 = por %p843_p13, %p842_p12 }
  0x76   : > { %p846_p2 = por %p845_p1, %p844_p0 }
  0x78   : > { %p847_p3 = pnand %p846_p2, %p840_p11 }
  0x7a   : > { %850 = shalt.err (!%p847_p3)  }
  0x7b   : > { %s851_s12 = scalar_lea.vmem %s1111_s16, 16  ;;  %p856_p5 = scmp.lt.s32.totalorder %s1111_s16, %s1064_s27 }
  0x7c   : > { %p852_p4 = scmp.ne.s32.totalorder %s1111_s16, %s851_s12  ;;  %p857_p6 = scmp.lt.s32.totalorder %s1067_s30, %s851_s12 }
  0x7e   : > { %p858_p7 = por %p857_p6, %p856_p5 }
  0x80   : > { %p859_p8 = pnand %p858_p7, %p852_p4 }
  0x82   : > { %862 = shalt.err (!%p859_p8)  }
  0x83   : > { %161 = dma.hbm_to_vmem [thread:$0]  %s148_s9, 16, %s1111_s16, [#allocation3] }
  0x84   : > { %s180_s13 = sadd.s32 6, %s1029_s0  ;;  %s648_s29 = sshll.u32 %s1116_s11, 4 }
  0x85   : > { %s182_s7 = sld [smem:[#allocation5 + %s180_s13]]  ;;  %s166_s23 = scalar_lea.hbm %s1203_s2, %s648_s29 }
  0x86   : > { %s556_s22 = scalar_lea.vmem %s1033_s28, 6 [#allocation2]  ;;  %s863_s24 = scalar_lea.hbm %s166_s23, 16 }
  0x87   : > { %p864_p9 = scmp.ne.s32.totalorder %s166_s23, %s863_s24  ;;  %p866_p10 = scmp.lt.u32.totalorder %s166_s23, %s1203_s2 }
  0x88   : > { %p867_p11 = scmp.lt.u32.totalorder %s1056_s21, %s863_s24  ;;  %p869_p13 = scmp.lt.u32.totalorder %s863_s24, %s166_s23 }
  0x8a   : > { %p868_p12 = por %p867_p11, %p866_p10 }
  0x8c   : > { %p870_p0 = por %p869_p13, %p868_p12 }
  0x8e   : > { %p871_p1 = pnand %p870_p0, %p864_p9 }
  0x90   : > { %874 = shalt.err (!%p871_p1)  }
  0x91   : > { %s875_s16 = scalar_lea.vmem %s177_s15, 16  ;;  %p880_p3 = scmp.lt.s32.totalorder %s177_s15, %s1064_s27 }
  0x92   : > { %p876_p2 = scmp.ne.s32.totalorder %s177_s15, %s875_s16  ;;  %p881_p4 = scmp.lt.s32.totalorder %s1067_s30, %s875_s16 }
  0x94   : > { %p882_p5 = por %p881_p4, %p880_p3 }
  0x96   : > { %p883_p6 = pnand %p882_p5, %p876_p2 }
  0x98   : > { %886 = shalt.err (!%p883_p6)  }
  0x99   : > { %179 = dma.hbm_to_vmem [thread:$0]  %s166_s23, 16, %s177_s15, [#allocation3] }
  0x9a   : > { %s194_s11 = sshll.u32 %s556_s22, 4  ;;  %s198_s8 = sadd.s32 7, %s1029_s0  ;;  %s195_s11 = int_to_ptr.vmem [resolvable:$true] %s194_s11 }
  0x9b   : > { %s200_s9 = sld [smem:[#allocation5 + %s198_s8]]  ;;  %s563_s18 = scalar_lea.vmem %s1033_s28, 7 [#allocation2] }
  0x9c   : > { %s650_s19 = sshll.u32 %s182_s7, 4  ;;  %s212_s20 = sshll.u32 %s563_s18, 4  ;;  %s213_s20 = int_to_ptr.vmem [resolvable:$true] %s212_s20 }
  0x9d   : > { %s184_s29 = scalar_lea.hbm %s1203_s2, %s650_s19 }
  0x9e   : > { %s887_s14 = scalar_lea.hbm %s184_s29, 16  ;;  %p890_p8 = scmp.lt.u32.totalorder %s184_s29, %s1203_s2 }
  0x9f   : > { %p888_p7 = scmp.ne.s32.totalorder %s184_s29, %s887_s14  ;;  %p891_p9 = scmp.lt.u32.totalorder %s1056_s21, %s887_s14 }
  0xa0   : > { %p893_p11 = scmp.lt.u32.totalorder %s887_s14, %s184_s29 }
  0xa1   : > { %p892_p10 = por %p891_p9, %p890_p8 }
  0xa3   : > { %p894_p12 = por %p893_p11, %p892_p10 }
  0xa5   : > { %p895_p13 = pnand %p894_p12, %p888_p7 }
  0xa7   : > { %898 = shalt.err (!%p895_p13)  }
  0xa8   : > { %s899_s0 = scalar_lea.vmem %s195_s11, 16  ;;  %p904_p1 = scmp.lt.s32.totalorder %s195_s11, %s1064_s27 }
  0xa9   : > { %p900_p0 = scmp.ne.s32.totalorder %s195_s11, %s899_s0  ;;  %p905_p2 = scmp.lt.s32.totalorder %s1067_s30, %s899_s0 }
  0xab   : > { %p906_p3 = por %p905_p2, %p904_p1 }
  0xad   : > { %p907_p4 = pnand %p906_p3, %p900_p0 }
  0xaf   : > { %910 = shalt.err (!%p907_p4)  }
  0xb0   : > { %197 = dma.hbm_to_vmem [thread:$0]  %s184_s29, 16, %s195_s11, [#allocation3] }
  0xb1   : > { %s652_s28 = sshll.u32 %s200_s9, 4 }
  0xb2   : > { %s202_s23 = scalar_lea.hbm %s1203_s2, %s652_s28 }
  0xb3   : > { %s911_s22 = scalar_lea.hbm %s202_s23, 16  ;;  %p914_p6 = scmp.lt.u32.totalorder %s202_s23, %s1203_s2 }
  0xb4   : > { %p912_p5 = scmp.ne.s32.totalorder %s202_s23, %s911_s22  ;;  %p915_p7 = scmp.lt.u32.totalorder %s1056_s21, %s911_s22 }
  0xb5   : > { %p917_p9 = scmp.lt.u32.totalorder %s911_s22, %s202_s23 }
  0xb6   : > { %p916_p8 = por %p915_p7, %p914_p6 }
  0xb8   : > { %p918_p10 = por %p917_p9, %p916_p8 }
  0xba   : > { %p919_p11 = pnand %p918_p10, %p912_p5 }
  0xbc   : > { %922 = shalt.err (!%p919_p11)  }
  0xbd   : > { %s923_s16 = scalar_lea.vmem %s213_s20, 16  ;;  %p928_p13 = scmp.lt.s32.totalorder %s213_s20, %s1064_s27 }
  0xbe   : > { %p924_p12 = scmp.ne.s32.totalorder %s213_s20, %s923_s16  ;;  %p929_p0 = scmp.lt.s32.totalorder %s1067_s30, %s923_s16 }
  0xc0   : > { %p930_p1 = por %p929_p0, %p928_p13 }
  0xc2   : > { %p931_p2 = pnand %p930_p1, %p924_p12 }
  0xc4   : > { %934 = shalt.err (!%p931_p2)  }
  0xc5   : > { %215 = dma.hbm_to_vmem [thread:$0]  %s202_s23, 16, %s213_s20, [#allocation3] }
  0xc6   : > { %s69_s26 = sadd.s32 1, %s973_s26  }
  0xc7   : > { %p66_p3 = scmp.ge.s32.totalorder %s69_s26, 2  }
  0xc8   :  { %s975_s21 = smov (%p66_p3), 0  }
  0xc9   :  { %68 = sbr.rel (!%p66_p3) target bundleno = 16 (0x10), region = 170 }
  0xd0 LB: > { %967 = dma.done.wait [#allocation3], 16  ;;  %s977_s21 = sphi %s975_s21, %s381_s21  }
  0xd1   : > { %968 = vsyncadd [#allocation3], 4294967280  ;;  %s381_s21 = sadd.s32 1, %s977_s21  }
  0xd2   : > { %p378_p4 = scmp.ge.s32.totalorder %s381_s21, 16  }
  0xd3   :  { %v390_v0 = vld [vmem:[%s1202_s1] sm:$0xff] (%p378_p4)  ;;  %v981_v1 = vmov (%p378_p4), 0   ;;  %v391_v2 = vld [vmem:[%s1202_s1 + $0x8] sm:$0xff] (%p378_p4)  ;;  %v407_v3 = vlaneseq (%p378_p4)  ;;  %s982_s19 = smov (%p378_p4), [#allocation6]  }
  0xd4   :  { %380 = sbr.rel (!%p378_p4) target bundleno = 208 (0xd0), region = 192  ;;  %726 = vset.pattern.permute.xlu0 (%p378_p4), %v981_v1  ;;  %v392_v4 = vld [vmem:[%s1204_s3] sm:$0x3] (%p378_p4)  ;;  %v389_v19 = vld [vmem:[#allocation2 + $0x8] sm:$0xff] (%p378_p4)  ;;  %s478_s20 = sshll.u32 (%p378_p4), %s982_s19, 4  ;;  %s479_s20 = int_to_ptr.vmem [resolvable:$true] %s478_s20 }
  0xd5   :  { %399 = vperm.xlu0 (%p378_p4), %726, %v390_v0   ;;  %v394_v5 = vrot.slane (%p378_p4), %v392_v4, 7  ;;  %v408_v6 = vshrl.u32 (%p378_p4), %v407_v3, 7  ;;  %v388_v14 = vld [vmem:[#allocation2] sm:$0xff] (%p378_p4)  ;;  %s935_s12 = scalar_lea.vmem (%p378_p4), %s479_s20, 256  ;;  %p940_p6 = scmp.lt.s32.totalorder (%p378_p4), %s479_s20, %s479_s20 }
  0xd6   :  { %v678_v42 = vld [vmem:[%s1205_s4] ss:$0 sm:$0xff] (%p378_p4)  ;;  %p936_p5 = scmp.ne.s32.totalorder (%p378_p4), %s479_s20, %s935_s12  ;;  %p941_p7 = scmp.lt.s32.totalorder (%p378_p4), %s935_s12, %s935_s12 }
  0xd7   :  { %v396_v7 = vsub.f32 (%p378_p4), %v392_v4, %v394_v5  ;;  %v409_v8 = vsub.s32 (%p378_p4), 1, %v408_v6  ;;  %v415_v9 = vsub.s32 (%p378_p4), 0, %v408_v6  ;;  %v679_v44 = vld [vmem:[%s1206_s5] ss:$0 sm:$0xff] (%p378_p4) }
  0xd8   :  { %p942_p8 = por (%p378_p4), %p941_p7, %p940_p6 }
  0xd9   :  { %404 = vperm.xlu0 (%p378_p4), %726, %v391_v2   ;;  %v410_v10 = vrot.slane (%p378_p4), %v396_v7, %v409_v8  ;;  %v416_v11 = vrot.slane (%p378_p4), %v392_v4, %v415_v9 }
  0xda   :  { %p943_p9 = pnand (%p378_p4), %p942_p8, %p936_p5 }
 0x154   :  { %v400_v12 = vpop.permute.xlu0 %399 }
 0x155   :  { %v411_v13 = vmul.f32 %v410_v10, %v400_v12 }
 0x157   :  { %v417_v15 = vadd.f32 %v416_v11, %v411_v13 }
 0x158   :  { %v405_v16 = vpop.permute.xlu0 %404 }
 0x159   :  { %v412_v17 = vmul.f32 %v410_v10, %v405_v16  ;;  %v419_v18 = vadd.f32 %v417_v15, %v388_v14 }
 0x15b   :  { %v418_v20 = vadd.f32 %v416_v11, %v412_v17  ;;  %421 = vadd.xlane.f32.xlu1 %v419_v18  ;;  %v427_v21 = vmul.f32 %v419_v18, %v419_v18 }
 0x15d   :  { %429 = vadd.xlane.f32.xlu0 %v427_v21  ;;  %v420_v22 = vadd.f32 %v418_v20, %v389_v19 }
 0x15f   :  { %423 = vadd.xlane.f32.xlu1 %v420_v22  ;;  %v428_v23 = vmul.f32 %v420_v22, %v420_v22 }
 0x163   :  { %431 = vadd.xlane.f32.xlu1 %v428_v23 }
 0x1e8   :  { %v422_v24 = vpop.xlane.xlu1 %421 }
 0x1e9   :  { %v425_v25 = vmul.f32 0.0078125, %v422_v24 }
 0x1ea   :  { %v430_v26 = vpop.xlane.xlu0 %429 }
 0x1eb   :  { %v435_v27 = vmul.f32 %v425_v25, %v425_v25  ;;  %v433_v28 = vmul.f32 0.0078125, %v430_v26  ;;  %v447_v40 = vsub.f32 %v419_v18, %v425_v25 }
 0x1ec   :  { %v424_v29 = vpop.xlane.xlu1 %423 }
 0x1ed   :  { %v437_v30 = vsub.f32 %v433_v28, %v435_v27  ;;  %v426_v31 = vmul.f32 0.0078125, %v424_v29 }
 0x1ef   :  { %v439_v32 = vmax.f32 %v437_v30, 0.0  ;;  %v436_v35 = vmul.f32 %v426_v31, %v426_v31  ;;  %v448_v46 = vsub.f32 %v420_v22, %v426_v31 }
 0x1f0   :  { %v432_v33 = vpop.xlane.xlu1 %431 }
 0x1f1   :  { %v441_v34 = vadd.f32 1e-12, %v439_v32  ;;  %v434_v36 = vmul.f32 0.0078125, %v432_v33 }
 0x1f3   :  { %727 = vrsqrt.f32 %v441_v34  ;;  %v438_v37 = vsub.f32 %v434_v36, %v436_v35 }
 0x1f5   :  { %v440_v38 = vmax.f32 %v438_v37, 0.0 }
 0x1f7   :  { %v442_v39 = vadd.f32 1e-12, %v440_v38 }
 0x1f9   :  { %729 = vrsqrt.f32 %v442_v39 }
 0x1fd   :  { %v728_v41 = vpop.eup %727 }
 0x1fe   :  { %v449_v43 = vmul.f32 %v728_v41, %v447_v40 }
 0x200   :  { %v457_v45 = vmul.f32 %v678_v42, %v449_v43 }
 0x202   :  { %v465_v47 = vadd.f32 %v679_v44, %v457_v45 }
 0x203   :  { %v730_v48 = vpop.eup %729 }
 0x204   :  { %v450_v49 = vmul.f32 %v730_v48, %v448_v46  ;;  %467 = vst [vmem:[#allocation6] sm:$0xff] %v465_v47 }
 0x206   :  { %v458_v50 = vmul.f32 %v678_v42, %v450_v49 }
 0x208   :  { %v466_v51 = vadd.f32 %v679_v44, %v458_v50 }
 0x20a   :  { %468 = vst [vmem:[#allocation6 + $0x8] sm:$0xff] %v466_v51 }
 0x20b   :  { %946 = shalt.err (!%p943_p9)
}
 0x20c   :  { %s947_s13 = scalar_lea.hbm %s1207_s6, 256 }
 0x20d   :  { %p948_p10 = scmp.ne.s32.totalorder %s1207_s6, %s947_s13  ;;  %p951_p11 = scmp.lt.u32.totalorder %s947_s13, %s1207_s6 }
 0x20f   :  { %p953_p12 = pnand %p951_p11, %p948_p10 }
 0x211   :  { %956 = shalt.err (!%p953_p12)
}
 0x212   :  { %s983_s0 = smov 128   ;;  %s984_s28 = smov 8  }
 0x213   :  { %484 = dma.vmem_to_hbm [thread:$0]  %s479_s20, 256, %s1207_s6, [#allocation7], %s983_s0, %s983_s0, %s984_s28  }
 0x214   :  { %969 = dma.done.wait [#allocation7], 256  }
 0x215   :  { %970 = vsyncadd [#allocation7], 4294967040 }
 0x216   :  { %488 = vsyncpa [#allocation7], 1 }
 0x217   :  { %489 = vsyncmov [#allocation3] }
 0x21a   :  { %s490_s23 = vpop.sfrf %489 }
 0x21b   :  { %p680_p13 = scmp.ne.s32.totalorder %s490_s23, 0 }
 0x21d   :  { %494 = shalt.err (%p680_p13)  }
 0x21e   :  { %496 = vsyncmov [#allocation3 + $0x1] }
 0x221   :  { %s497_s22 = vpop.sfrf %496 }
 0x222   :  { %p681_p0 = scmp.ne.s32.totalorder %s497_s22, 0 }
 0x224   :  { %501 = shalt.err (%p681_p0)  }

</bundles_post_ra>
